<compile_context>
chip_gen: v7x
topology: tpu7x:2x2x1
jax: 0.10.0
libtpu: 0.0.40
codegen_flags: <defaults>
</compile_context>

<pallas_src>
import numpy as np
import jax
import jax.numpy as jnp
from jax import lax
from jax.experimental import pallas as pl
from jax.experimental.pallas import tpu as pltpu


# ----------------------------------------------------------------------------
# Host-side deterministic parameter construction (DCT basis, quant tables).
# ----------------------------------------------------------------------------

_LUMA_QTABLE = np.array(
    [[16, 11, 10, 16, 24, 40, 51, 61],
     [12, 12, 14, 19, 26, 58, 60, 55],
     [14, 13, 16, 24, 40, 57, 69, 56],
     [14, 17, 22, 29, 51, 87, 80, 62],
     [18, 22, 37, 56, 68, 109, 103, 77],
     [24, 35, 55, 64, 81, 104, 113, 92],
     [49, 64, 78, 87, 103, 121, 120, 101],
     [72, 92, 95, 98, 112, 100, 103, 99]], dtype=np.float64)

_CHROMA_QTABLE = np.array(
    [[17, 18, 24, 47, 99, 99, 99, 99],
     [18, 21, 26, 66, 99, 99, 99, 99],
     [24, 26, 56, 99, 99, 99, 99, 99],
     [47, 66, 99, 99, 99, 99, 99, 99],
     [99, 99, 99, 99, 99, 99, 99, 99],
     [99, 99, 99, 99, 99, 99, 99, 99],
     [99, 99, 99, 99, 99, 99, 99, 99],
     [99, 99, 99, 99, 99, 99, 99, 99]], dtype=np.float64)


def _dct8_matrix():
    d = np.zeros((8, 8), dtype=np.float64)
    for k in range(8):
        c = np.sqrt(1.0 / 8.0) if k == 0 else np.sqrt(2.0 / 8.0)
        for n in range(8):
            d[k, n] = c * np.cos((2 * n + 1) * k * np.pi / 16.0)
    return d


def _blockdiag_dct(size):
    """kron(I_{size/8}, D8): left-multiply (and right-multiply by transpose)
    performs an independent 8x8 2-D DCT on every 8x8 tile."""
    assert size % 8 == 0
    return np.kron(np.eye(size // 8), _dct8_matrix())


def _subsample_matrix(size):
    """(size/2, size) row-pair averaging (0.5 at (i, 2i) and (i, 2i+1))."""
    s = np.zeros((size // 2, size), dtype=np.float64)
    for i in range(size // 2):
        s[i, 2 * i] = 0.5
        s[i, 2 * i + 1] = 0.5
    return s


def _scaled_qtable(base, Q):
    # libjpeg jpeg_quality_scaling + quant table scaling (integer math).
    Q = int(max(1, min(100, Q)))
    scale = (5000 // Q) if Q < 50 else (200 - 2 * Q)
    t = np.floor((base * scale + 50.0) / 100.0)
    return np.clip(t, 1.0, 255.0)


def _tiled_qtable(base, Q, h, w):
    q = _scaled_qtable(base, Q)
    return np.tile(q, (h // 8, w // 8))


def _ceil_to(n, m):
    return ((n + m - 1) // m) * m


def _choose_row_tile(h):
    """Sublane (H) tile: multiple of 16, <= 128.  Returns (th, padded_H)."""
    if h <= 128:
        return h, h
    for t in range(128, 15, -16):
        if h % t == 0:
            return t, h
    return 128, _ceil_to(h, 128)        # pad instead of O(H^2) constants


def _choose_col_tile(w):
    """Lane (W) tile: full width if <= 128, else exactly 128 (pad W)."""
    if w <= 128:
        return w, w
    if w % 128 == 0:
        return 128, w
    return 128, _ceil_to(w, 128)        # pad instead of O(W^2) constants


def _choose_batch_block(b, n_spatial_tiles):
    """Images per grid step: amortize the ~0.35us/step pipeline overhead but
    keep >= 2 grid steps so both v7x TensorCores get work."""
    for nb in (4, 2):
        if b % nb == 0 and (b // nb) * n_spatial_tiles >= 2:
            return nb
    return 1


# ----------------------------------------------------------------------------
# Pallas kernel: nb images x one (3, th, tw) macroblock-aligned tile per step.
# ----------------------------------------------------------------------------

def _jpeg_kernel(img_ref,
                 dh_ref, dht_ref, dw_ref, dwt_ref,        # luma DCT / IDCT (bf16)
                 mh_ref, mwt2_ref, mhti_ref, mwi2_ref,    # fused lane-dense chroma (bf16)
                 qy_ref, iqy_ref, qc2_ref, iqc2_ref,      # quant tables (f32)
                 out_ref):
    f32 = jnp.float32
    bf16 = jnp.bfloat16
    nb = img_ref.shape[0]
    tw = qy_ref.shape[1]

    def mm(a, b):
        # bf16 MXU operands, f32 accumulation.
        return jnp.dot(a.astype(bf16), b.astype(bf16),
                       preferred_element_type=f32)

    def finalize(v):
        # decoded uint8 pixel -> ToTensor + Normalize(0.5, 0.5), exact [-1,1]
        p = jnp.round(jnp.clip(v, 0.0, 255.0))
        return jnp.clip(p * (2.0 / 255.0) - 1.0, -1.0, 1.0)

    def one_image(n, carry):
        # --- pixel quantization (torch .to(uint8) truncates; values >= 0) ---
        x = jnp.clip(img_ref[n], -1.0, 1.0)               # (3, th, tw) f32
        pix = jnp.floor((x + 1.0) * 127.5)                # uint8 values as f32
        r = pix[0]
        g = pix[1]
        b = pix[2]

        # --- RGB -> YCbCr (Y level-shifted by -128, Cb/Cr centered at 0) ----
        y = 0.299 * r + 0.587 * g + 0.114 * b - 128.0
        cb = -0.168736 * r - 0.331264 * g + 0.5 * b
        cr = 0.5 * r - 0.418688 * g - 0.081312 * b

        # --- luma: 8x8 block DCT -> quantize/dequantize -> block IDCT -------
        yc = mm(dh_ref[...], mm(y, dwt_ref[...]))
        yq = jnp.round(yc * iqy_ref[...]) * qy_ref[...]
        yf = mm(dht_ref[...], mm(yq, dw_ref[...])) + 128.0

        # --- chroma (lane-dense [Cb | Cr]): fused 4:2:0 subsample + DCT,
        #     quantize/dequantize, fused IDCT + 2x nearest upsample ----------
        # TODO(synk): libjpeg's default decoder uses "fancy" triangular chroma
        # upsampling; nearest-neighbour replication is used here instead.
        c2 = jnp.concatenate([cb, cr], axis=-1)           # (th, 2*tw)
        cc = mm(mh_ref[...], mm(c2, mwt2_ref[...]))       # (th/2, tw)
        cq = jnp.round(cc * iqc2_ref[...]) * qc2_ref[...]
        up2 = mm(mhti_ref[...], mm(cq, mwi2_ref[...]))    # (th, 2*tw)
        cb_up = up2[:, :tw]
        cr_up = up2[:, tw:]

        # --- YCbCr -> RGB, uint8, ToTensor + Normalize: per-channel store ---
        out_ref[n, 0] = finalize(yf + 1.402 * cr_up)
        out_ref[n, 1] = finalize(yf - 0.344136 * cb_up - 0.714136 * cr_up)
        out_ref[n, 2] = finalize(yf + 1.772 * cb_up)
        return carry

    lax.fori_loop(0, nb, one_image, 0, unroll=True)


# ----------------------------------------------------------------------------
# Wrapper
# ----------------------------------------------------------------------------

def jpeg_test(image, Q=50, subsample=2):
    """Pallas equivalent of JpegTest(Q, subsample=2).forward(image).

    image: float32 (B, 3, H, W) in [-1, 1].
    """
    assert subsample == 2, "only 4:2:0 (subsample=2) is implemented"
    B, C, H, W = image.shape
    assert C == 3

    # Tile selection + padding.  libjpeg fills partial MCUs by edge
    # replication; the same edge padding is used for tile alignment (padded
    # pixels never influence real pixels: DCT / 2x2 subsampling are local).
    H16, W16 = _ceil_to(H, 16), _ceil_to(W, 16)
    th, Hp = _choose_row_tile(H16)
    tw, Wp = _choose_col_tile(W16)
    img = image.astype(jnp.float32)
    if (Hp, Wp) != (H, W):
        img = jnp.pad(img, ((0, 0), (0, 0), (0, Hp - H), (0, Wp - W)),
                      mode="edge")

    nb = _choose_batch_block(B, (Hp // th) * (Wp // tw))
    th2, tw2 = th // 2, tw // 2

    f32 = lambda a: jnp.asarray(np.ascontiguousarray(a, dtype=np.float32))
    bf = lambda a: f32(a).astype(jnp.bfloat16)

    # Luma block-diagonal DCT matrices for one tile (and transposes).
    dh_np = _blockdiag_dct(th)                                # (th, th)
    dw_np = _blockdiag_dct(tw)                                # (tw, tw)

    # Fused lane-dense chroma matrices: Mh = D_{th/2} @ S_th, Mw = D_{tw/2} @ S_tw.
    #   forward:  [Ccb|Ccr] = Mh @ [cb|cr] @ diag(Mw.T, Mw.T)   (subsample+DCT)
    #   inverse:  [cb_up|cr_up] = (2 Mh).T @ coeffq @ diag(2 Mw, 2 Mw)
    mh_np = _blockdiag_dct(th2) @ _subsample_matrix(th)       # (th/2, th)
    mw_np = _blockdiag_dct(tw2) @ _subsample_matrix(tw)       # (tw/2, tw)

    def _diag2(a):
        z = np.zeros_like(a)
        return np.block([[a, z], [z, a]])

    dh, dht = bf(dh_np), bf(dh_np.T)
    dw, dwt = bf(dw_np), bf(dw_np.T)
    mh = bf(mh_np)                                            # (th/2, th)
    mwt2 = bf(_diag2(mw_np.T))                                # (2*tw, tw)
    mhti = bf(2.0 * mh_np.T)                                  # (th, th/2)
    mwi2 = bf(_diag2(2.0 * mw_np))                            # (tw, 2*tw)

    qy_np = _tiled_qtable(_LUMA_QTABLE, Q, th, tw)            # (th, tw)
    qc_np = _tiled_qtable(_CHROMA_QTABLE, Q, th2, tw2)        # (th/2, tw/2)
    qc2_np = np.concatenate([qc_np, qc_np], axis=1)           # (th/2, tw)
    qy, iqy = f32(qy_np), f32(1.0 / qy_np)
    qc2, iqc2 = f32(qc2_np), f32(1.0 / qc2_np)

    const2 = lambda b, i, j: (0, 0)
    img_map = lambda b, i, j: (b, 0, i, j)
    grid = (B // nb, Hp // th, Wp // tw)

    out = pl.pallas_call(
        _jpeg_kernel,
        out_shape=jax.ShapeDtypeStruct((B, 3, Hp, Wp), jnp.float32),
        grid_spec=pltpu.PrefetchScalarGridSpec(
            num_scalar_prefetch=0,
            grid=grid,
            in_specs=[
                pl.BlockSpec((nb, 3, th, tw), img_map),     # image
                pl.BlockSpec((th, th), const2),             # dh
                pl.BlockSpec((th, th), const2),             # dht
                pl.BlockSpec((tw, tw), const2),             # dw
                pl.BlockSpec((tw, tw), const2),             # dwt
                pl.BlockSpec((th2, th), const2),            # mh
                pl.BlockSpec((2 * tw, tw), const2),         # mwt2
                pl.BlockSpec((th, th2), const2),            # mhti
                pl.BlockSpec((tw, 2 * tw), const2),         # mwi2
                pl.BlockSpec((th, tw), const2),             # qy
                pl.BlockSpec((th, tw), const2),             # iqy
                pl.BlockSpec((th2, tw), const2),            # qc2
                pl.BlockSpec((th2, tw), const2),            # iqc2
            ],
            out_specs=pl.BlockSpec((nb, 3, th, tw), img_map),
        ),
        compiler_params=pltpu.CompilerParams(
            dimension_semantics=("parallel", "parallel", "parallel")),
    )(img, dh, dht, dw, dwt, mh, mwt2, mhti, mwi2, qy, iqy, qc2, iqc2)

    if (Hp, Wp) != (H, W):
        out = out[:, :, :H, :W]
    return out


if __name__ == "__main__":
    key = jax.random.PRNGKey(0)
    B, C, H, W = 2, 3, 16, 16
    image = jax.random.uniform(key, (B, C, H, W), dtype=jnp.float32,
                               minval=-1.0, maxval=1.0)

    out = jpeg_test(image, Q=50, subsample=2)
    out = jax.block_until_ready(out)

    assert out.shape == (B, C, H, W)
    assert out.dtype == jnp.float32
    assert bool(jnp.all(jnp.isfinite(out)))
    assert bool(jnp.all(out >= -1.0)) and bool(jnp.all(out <= 1.0))

    print("KERNEL_OK")
</pallas_src>

<mosaic_0001>
module attributes {stable_mosaic.version = 11 : i64} {
  func.func @_jpeg_kernel(%arg0: i32, %arg1: i32, %arg2: i32, %arg3: memref<1x3x16x16xf32, #tpu.memory_space<vmem>>, %arg4: memref<16x16xbf16, #tpu.memory_space<vmem>>, %arg5: memref<16x16xbf16, #tpu.memory_space<vmem>>, %arg6: memref<16x16xbf16, #tpu.memory_space<vmem>>, %arg7: memref<16x16xbf16, #tpu.memory_space<vmem>>, %arg8: memref<8x16xbf16, #tpu.memory_space<vmem>>, %arg9: memref<32x16xbf16, #tpu.memory_space<vmem>>, %arg10: memref<16x8xbf16, #tpu.memory_space<vmem>>, %arg11: memref<16x32xbf16, #tpu.memory_space<vmem>>, %arg12: memref<16x16xf32, #tpu.memory_space<vmem>>, %arg13: memref<16x16xf32, #tpu.memory_space<vmem>>, %arg14: memref<8x16xf32, #tpu.memory_space<vmem>>, %arg15: memref<8x16xf32, #tpu.memory_space<vmem>>, %arg16: memref<1x3x16x16xf32, #tpu.memory_space<vmem>>) attributes {dimension_semantics = [#tpu.dimension_semantics<parallel>, #tpu.dimension_semantics<parallel>, #tpu.dimension_semantics<parallel>], iteration_bounds = array<i64: 2, 1, 1>, scalar_prefetch = 0 : i64, scratch_operands = 0 : i64, tpu.core_type = #tpu.core_type<tc>, window_params = [{transform_indices = @transform_0, window_bounds = array<i64: 1, 3, 16, 16>}, {pipeline_mode = #tpu.pipeline_mode<synchronous>, transform_indices = @transform_1, window_bounds = array<i64: 16, 16>}, {pipeline_mode = #tpu.pipeline_mode<synchronous>, transform_indices = @transform_2, window_bounds = array<i64: 16, 16>}, {pipeline_mode = #tpu.pipeline_mode<synchronous>, transform_indices = @transform_3, window_bounds = array<i64: 16, 16>}, {pipeline_mode = #tpu.pipeline_mode<synchronous>, transform_indices = @transform_4, window_bounds = array<i64: 16, 16>}, {pipeline_mode = #tpu.pipeline_mode<synchronous>, transform_indices = @transform_5, window_bounds = array<i64: 8, 16>}, {pipeline_mode = #tpu.pipeline_mode<synchronous>, transform_indices = @transform_6, window_bounds = array<i64: 32, 16>}, {pipeline_mode = #tpu.pipeline_mode<synchronous>, transform_indices = @transform_7, window_bounds = array<i64: 16, 8>}, {pipeline_mode = #tpu.pipeline_mode<synchronous>, transform_indices = @transform_8, window_bounds = array<i64: 16, 32>}, {pipeline_mode = #tpu.pipeline_mode<synchronous>, transform_indices = @transform_9, window_bounds = array<i64: 16, 16>}, {pipeline_mode = #tpu.pipeline_mode<synchronous>, transform_indices = @transform_10, window_bounds = array<i64: 16, 16>}, {pipeline_mode = #tpu.pipeline_mode<synchronous>, transform_indices = @transform_11, window_bounds = array<i64: 8, 16>}, {pipeline_mode = #tpu.pipeline_mode<synchronous>, transform_indices = @transform_12, window_bounds = array<i64: 8, 16>}, {transform_indices = @transform_13, window_bounds = array<i64: 1, 3, 16, 16>}]} {
    %c0_i32 = arith.constant 0 : i32
    %0 = arith.index_cast %c0_i32 : i32 to index
    %c0 = arith.constant 0 : index
    %c0_0 = arith.constant 0 : index
    %c0_1 = arith.constant 0 : index
    %1 = vector.load %arg3[%0, %c0, %c0_0, %c0_1] : memref<1x3x16x16xf32, #tpu.memory_space<vmem>>, vector<1x3x16x16xf32>
    %2 = vector.shape_cast %1 : vector<1x3x16x16xf32> to vector<3x16x16xf32>
    %cst = arith.constant -1.000000e+00 : f32
    %cst_2 = arith.constant 1.000000e+00 : f32
    %3 = vector.broadcast %cst : f32 to vector<3x16x16xf32>
    %4 = arith.maximumf %3, %2 : vector<3x16x16xf32>
    %5 = vector.broadcast %cst_2 : f32 to vector<3x16x16xf32>
    %6 = arith.minimumf %5, %4 : vector<3x16x16xf32>
    %cst_3 = arith.constant 1.000000e+00 : f32
    %7 = vector.broadcast %cst_3 : f32 to vector<3x16x16xf32>
    %8 = arith.addf %6, %7 : vector<3x16x16xf32>
    %cst_4 = arith.constant 1.275000e+02 : f32
    %9 = vector.broadcast %cst_4 : f32 to vector<3x16x16xf32>
    %10 = arith.mulf %8, %9 : vector<3x16x16xf32>
    %11 = math.floor %10 : vector<3x16x16xf32>
    %12 = vector.extract_strided_slice %11 {offsets = [0, 0, 0], sizes = [1, 16, 16], strides = [1, 1, 1]} : vector<3x16x16xf32> to vector<1x16x16xf32>
    %13 = vector.shape_cast %12 : vector<1x16x16xf32> to vector<16x16xf32>
    %14 = vector.extract_strided_slice %11 {offsets = [1, 0, 0], sizes = [1, 16, 16], strides = [1, 1, 1]} : vector<3x16x16xf32> to vector<1x16x16xf32>
    %15 = vector.shape_cast %14 : vector<1x16x16xf32> to vector<16x16xf32>
    %16 = vector.extract_strided_slice %11 {offsets = [2, 0, 0], sizes = [1, 16, 16], strides = [1, 1, 1]} : vector<3x16x16xf32> to vector<1x16x16xf32>
    %17 = vector.shape_cast %16 : vector<1x16x16xf32> to vector<16x16xf32>
    %cst_5 = arith.constant 2.990000e-01 : f32
    %18 = vector.broadcast %cst_5 : f32 to vector<16x16xf32>
    %19 = arith.mulf %18, %13 : vector<16x16xf32>
    %cst_6 = arith.constant 5.870000e-01 : f32
    %20 = vector.broadcast %cst_6 : f32 to vector<16x16xf32>
    %21 = arith.mulf %20, %15 : vector<16x16xf32>
    %22 = arith.addf %19, %21 : vector<16x16xf32>
    %cst_7 = arith.constant 1.140000e-01 : f32
    %23 = vector.broadcast %cst_7 : f32 to vector<16x16xf32>
    %24 = arith.mulf %23, %17 : vector<16x16xf32>
    %25 = arith.addf %22, %24 : vector<16x16xf32>
    %cst_8 = arith.constant 1.280000e+02 : f32
    %26 = vector.broadcast %cst_8 : f32 to vector<16x16xf32>
    %27 = arith.subf %25, %26 : vector<16x16xf32>
    %cst_9 = arith.constant -1.687360e-01 : f32
    %28 = vector.broadcast %cst_9 : f32 to vector<16x16xf32>
    %29 = arith.mulf %28, %13 : vector<16x16xf32>
    %cst_10 = arith.constant 3.312640e-01 : f32
    %30 = vector.broadcast %cst_10 : f32 to vector<16x16xf32>
    %31 = arith.mulf %30, %15 : vector<16x16xf32>
    %32 = arith.subf %29, %31 : vector<16x16xf32>
    %cst_11 = arith.constant 5.000000e-01 : f32
    %33 = vector.broadcast %cst_11 : f32 to vector<16x16xf32>
    %34 = arith.mulf %33, %17 : vector<16x16xf32>
    %35 = arith.addf %32, %34 : vector<16x16xf32>
    %cst_12 = arith.constant 5.000000e-01 : f32
    %36 = vector.broadcast %cst_12 : f32 to vector<16x16xf32>
    %37 = arith.mulf %36, %13 : vector<16x16xf32>
    %cst_13 = arith.constant 4.186880e-01 : f32
    %38 = vector.broadcast %cst_13 : f32 to vector<16x16xf32>
    %39 = arith.mulf %38, %15 : vector<16x16xf32>
    %40 = arith.subf %37, %39 : vector<16x16xf32>
    %cst_14 = arith.constant 8.131200e-02 : f32
    %41 = vector.broadcast %cst_14 : f32 to vector<16x16xf32>
    %42 = arith.mulf %41, %17 : vector<16x16xf32>
    %43 = arith.subf %40, %42 : vector<16x16xf32>
    %c0_15 = arith.constant 0 : index
    %c0_16 = arith.constant 0 : index
    %44 = vector.load %arg4[%c0_15, %c0_16] : memref<16x16xbf16, #tpu.memory_space<vmem>>, vector<16x16xbf16>
    %c0_17 = arith.constant 0 : index
    %c0_18 = arith.constant 0 : index
    %45 = vector.load %arg7[%c0_17, %c0_18] : memref<16x16xbf16, #tpu.memory_space<vmem>>, vector<16x16xbf16>
    %46 = arith.truncf %27 : vector<16x16xf32> to vector<16x16xbf16>
    %cst_19 = arith.constant dense<0.000000e+00> : vector<16x16xf32>
    %47 = tpu.matmul %46, %45, %cst_19 {dimension_numbers = #tpu.dot_dimension_numbers<[1], [0], [0], [1], [0, 0, 1, 1], [], []>} : vector<16x16xbf16>, vector<16x16xbf16>, vector<16x16xf32> -> vector<16x16xf32>
    %48 = arith.truncf %47 : vector<16x16xf32> to vector<16x16xbf16>
    %cst_20 = arith.constant dense<0.000000e+00> : vector<16x16xf32>
    %49 = tpu.matmul %44, %48, %cst_20 {dimension_numbers = #tpu.dot_dimension_numbers<[1], [0], [0], [1], [0, 0, 1, 1], [], []>} : vector<16x16xbf16>, vector<16x16xbf16>, vector<16x16xf32> -> vector<16x16xf32>
    %c0_21 = arith.constant 0 : index
    %c0_22 = arith.constant 0 : index
    %50 = vector.load %arg13[%c0_21, %c0_22] : memref<16x16xf32, #tpu.memory_space<vmem>>, vector<16x16xf32>
    %51 = arith.mulf %49, %50 : vector<16x16xf32>
    %52 = math.roundeven %51 : vector<16x16xf32>
    %c0_23 = arith.constant 0 : index
    %c0_24 = arith.constant 0 : index
    %53 = vector.load %arg12[%c0_23, %c0_24] : memref<16x16xf32, #tpu.memory_space<vmem>>, vector<16x16xf32>
    %54 = arith.mulf %52, %53 : vector<16x16xf32>
    %c0_25 = arith.constant 0 : index
    %c0_26 = arith.constant 0 : index
    %55 = vector.load %arg5[%c0_25, %c0_26] : memref<16x16xbf16, #tpu.memory_space<vmem>>, vector<16x16xbf16>
    %c0_27 = arith.constant 0 : index
    %c0_28 = arith.constant 0 : index
    %56 = vector.load %arg6[%c0_27, %c0_28] : memref<16x16xbf16, #tpu.memory_space<vmem>>, vector<16x16xbf16>
    %57 = arith.truncf %54 : vector<16x16xf32> to vector<16x16xbf16>
    %cst_29 = arith.constant dense<0.000000e+00> : vector<16x16xf32>
    %58 = tpu.matmul %57, %56, %cst_29 {dimension_numbers = #tpu.dot_dimension_numbers<[1], [0], [0], [1], [0, 0, 1, 1], [], []>} : vector<16x16xbf16>, vector<16x16xbf16>, vector<16x16xf32> -> vector<16x16xf32>
    %59 = arith.truncf %58 : vector<16x16xf32> to vector<16x16xbf16>
    %cst_30 = arith.constant dense<0.000000e+00> : vector<16x16xf32>
    %60 = tpu.matmul %55, %59, %cst_30 {dimension_numbers = #tpu.dot_dimension_numbers<[1], [0], [0], [1], [0, 0, 1, 1], [], []>} : vector<16x16xbf16>, vector<16x16xbf16>, vector<16x16xf32> -> vector<16x16xf32>
    %cst_31 = arith.constant 1.280000e+02 : f32
    %61 = vector.broadcast %cst_31 : f32 to vector<16x16xf32>
    %62 = arith.addf %60, %61 : vector<16x16xf32>
    %63 = tpu.concatenate %35, %43 in 1 : vector<16x16xf32>, vector<16x16xf32> -> vector<16x32xf32>
    %c0_32 = arith.constant 0 : index
    %c0_33 = arith.constant 0 : index
    %64 = vector.load %arg8[%c0_32, %c0_33] : memref<8x16xbf16, #tpu.memory_space<vmem>>, vector<8x16xbf16>
    %c0_34 = arith.constant 0 : index
    %c0_35 = arith.constant 0 : index
    %65 = vector.load %arg9[%c0_34, %c0_35] : memref<32x16xbf16, #tpu.memory_space<vmem>>, vector<32x16xbf16>
    %66 = arith.truncf %63 : vector<16x32xf32> to vector<16x32xbf16>
    %cst_36 = arith.constant dense<0.000000e+00> : vector<16x16xf32>
    %67 = tpu.matmul %66, %65, %cst_36 {dimension_numbers = #tpu.dot_dimension_numbers<[1], [0], [0], [1], [0, 0, 1, 1], [], []>} : vector<16x32xbf16>, vector<32x16xbf16>, vector<16x16xf32> -> vector<16x16xf32>
    %68 = arith.truncf %67 : vector<16x16xf32> to vector<16x16xbf16>
    %cst_37 = arith.constant dense<0.000000e+00> : vector<8x16xf32>
    %69 = tpu.matmul %64, %68, %cst_37 {dimension_numbers = #tpu.dot_dimension_numbers<[1], [0], [0], [1], [0, 0, 1, 1], [], []>} : vector<8x16xbf16>, vector<16x16xbf16>, vector<8x16xf32> -> vector<8x16xf32>
    %c0_38 = arith.constant 0 : index
    %c0_39 = arith.constant 0 : index
    %70 = vector.load %arg15[%c0_38, %c0_39] : memref<8x16xf32, #tpu.memory_space<vmem>>, vector<8x16xf32>
    %71 = arith.mulf %69, %70 : vector<8x16xf32>
    %72 = math.roundeven %71 : vector<8x16xf32>
    %c0_40 = arith.constant 0 : index
    %c0_41 = arith.constant 0 : index
    %73 = vector.load %arg14[%c0_40, %c0_41] : memref<8x16xf32, #tpu.memory_space<vmem>>, vector<8x16xf32>
    %74 = arith.mulf %72, %73 : vector<8x16xf32>
    %c0_42 = arith.constant 0 : index
    %c0_43 = arith.constant 0 : index
    %75 = vector.load %arg10[%c0_42, %c0_43] : memref<16x8xbf16, #tpu.memory_space<vmem>>, vector<16x8xbf16>
    %c0_44 = arith.constant 0 : index
    %c0_45 = arith.constant 0 : index
    %76 = vector.load %arg11[%c0_44, %c0_45] : memref<16x32xbf16, #tpu.memory_space<vmem>>, vector<16x32xbf16>
    %77 = arith.truncf %74 : vector<8x16xf32> to vector<8x16xbf16>
    %cst_46 = arith.constant dense<0.000000e+00> : vector<8x32xf32>
    %78 = tpu.matmul %77, %76, %cst_46 {dimension_numbers = #tpu.dot_dimension_numbers<[1], [0], [0], [1], [0, 0, 1, 1], [], []>} : vector<8x16xbf16>, vector<16x32xbf16>, vector<8x32xf32> -> vector<8x32xf32>
    %79 = arith.truncf %78 : vector<8x32xf32> to vector<8x32xbf16>
    %cst_47 = arith.constant dense<0.000000e+00> : vector<16x32xf32>
    %80 = tpu.matmul %75, %79, %cst_47 {dimension_numbers = #tpu.dot_dimension_numbers<[1], [0], [0], [1], [0, 0, 1, 1], [], []>} : vector<16x8xbf16>, vector<8x32xbf16>, vector<16x32xf32> -> vector<16x32xf32>
    %81 = vector.extract_strided_slice %80 {offsets = [0, 0], sizes = [16, 16], strides = [1, 1]} : vector<16x32xf32> to vector<16x16xf32>
    %82 = vector.extract_strided_slice %80 {offsets = [0, 16], sizes = [16, 16], strides = [1, 1]} : vector<16x32xf32> to vector<16x16xf32>
    %cst_48 = arith.constant 1.402000e+00 : f32
    %83 = vector.broadcast %cst_48 : f32 to vector<16x16xf32>
    %84 = arith.mulf %83, %82 : vector<16x16xf32>
    %85 = arith.addf %62, %84 : vector<16x16xf32>
    %cst_49 = arith.constant 0.000000e+00 : f32
    %cst_50 = arith.constant 2.550000e+02 : f32
    %86 = vector.broadcast %cst_49 : f32 to vector<16x16xf32>
    %87 = arith.maximumf %86, %85 : vector<16x16xf32>
    %88 = vector.broadcast %cst_50 : f32 to vector<16x16xf32>
    %89 = arith.minimumf %88, %87 : vector<16x16xf32>
    %90 = math.roundeven %89 : vector<16x16xf32>
    %cst_51 = arith.constant 0.00784313772 : f32
    %91 = vector.broadcast %cst_51 : f32 to vector<16x16xf32>
    %92 = arith.mulf %90, %91 : vector<16x16xf32>
    %cst_52 = arith.constant 1.000000e+00 : f32
    %93 = vector.broadcast %cst_52 : f32 to vector<16x16xf32>
    %94 = arith.subf %92, %93 : vector<16x16xf32>
    %cst_53 = arith.constant -1.000000e+00 : f32
    %cst_54 = arith.constant 1.000000e+00 : f32
    %95 = vector.broadcast %cst_53 : f32 to vector<16x16xf32>
    %96 = arith.maximumf %95, %94 : vector<16x16xf32>
    %97 = vector.broadcast %cst_54 : f32 to vector<16x16xf32>
    %98 = arith.minimumf %97, %96 : vector<16x16xf32>
    %99 = arith.index_cast %c0_i32 : i32 to index
    %c0_55 = arith.constant 0 : index
    %c0_56 = arith.constant 0 : index
    %c0_57 = arith.constant 0 : index
    %100 = vector.load %arg16[%99, %c0_55, %c0_56, %c0_57] : memref<1x3x16x16xf32, #tpu.memory_space<vmem>>, vector<1x1x16x16xf32>
    %101 = vector.shape_cast %100 : vector<1x1x16x16xf32> to vector<16x16xf32>
    %102 = vector.shape_cast %98 : vector<16x16xf32> to vector<1x1x16x16xf32>
    tpu.vector_store %arg16[%99, %c0_55, %c0_56, %c0_57], %102 {strides = array<i32>} : memref<1x3x16x16xf32, #tpu.memory_space<vmem>>, vector<1x1x16x16xf32>,
    %cst_58 = arith.constant 3.441360e-01 : f32
    %103 = vector.broadcast %cst_58 : f32 to vector<16x16xf32>
    %104 = arith.mulf %103, %81 : vector<16x16xf32>
    %105 = arith.subf %62, %104 : vector<16x16xf32>
    %cst_59 = arith.constant 7.141360e-01 : f32
    %106 = vector.broadcast %cst_59 : f32 to vector<16x16xf32>
    %107 = arith.mulf %106, %82 : vector<16x16xf32>
    %108 = arith.subf %105, %107 : vector<16x16xf32>
    %cst_60 = arith.constant 0.000000e+00 : f32
    %cst_61 = arith.constant 2.550000e+02 : f32
    %109 = vector.broadcast %cst_60 : f32 to vector<16x16xf32>
    %110 = arith.maximumf %109, %108 : vector<16x16xf32>
    %111 = vector.broadcast %cst_61 : f32 to vector<16x16xf32>
    %112 = arith.minimumf %111, %110 : vector<16x16xf32>
    %113 = math.roundeven %112 : vector<16x16xf32>
    %cst_62 = arith.constant 0.00784313772 : f32
    %114 = vector.broadcast %cst_62 : f32 to vector<16x16xf32>
    %115 = arith.mulf %113, %114 : vector<16x16xf32>
    %cst_63 = arith.constant 1.000000e+00 : f32
    %116 = vector.broadcast %cst_63 : f32 to vector<16x16xf32>
    %117 = arith.subf %115, %116 : vector<16x16xf32>
    %cst_64 = arith.constant -1.000000e+00 : f32
    %cst_65 = arith.constant 1.000000e+00 : f32
    %118 = vector.broadcast %cst_64 : f32 to vector<16x16xf32>
    %119 = arith.maximumf %118, %117 : vector<16x16xf32>
    %120 = vector.broadcast %cst_65 : f32 to vector<16x16xf32>
    %121 = arith.minimumf %120, %119 : vector<16x16xf32>
    %122 = arith.index_cast %c0_i32 : i32 to index
    %c1 = arith.constant 1 : index
    %c0_66 = arith.constant 0 : index
    %c0_67 = arith.constant 0 : index
    %123 = vector.load %arg16[%122, %c1, %c0_66, %c0_67] : memref<1x3x16x16xf32, #tpu.memory_space<vmem>>, vector<1x1x16x16xf32>
    %124 = vector.shape_cast %123 : vector<1x1x16x16xf32> to vector<16x16xf32>
    %125 = vector.shape_cast %121 : vector<16x16xf32> to vector<1x1x16x16xf32>
    tpu.vector_store %arg16[%122, %c1, %c0_66, %c0_67], %125 {strides = array<i32>} : memref<1x3x16x16xf32, #tpu.memory_space<vmem>>, vector<1x1x16x16xf32>,
    %cst_68 = arith.constant 1.772000e+00 : f32
    %126 = vector.broadcast %cst_68 : f32 to vector<16x16xf32>
    %127 = arith.mulf %126, %81 : vector<16x16xf32>
    %128 = arith.addf %62, %127 : vector<16x16xf32>
    %cst_69 = arith.constant 0.000000e+00 : f32
    %cst_70 = arith.constant 2.550000e+02 : f32
    %129 = vector.broadcast %cst_69 : f32 to vector<16x16xf32>
    %130 = arith.maximumf %129, %128 : vector<16x16xf32>
    %131 = vector.broadcast %cst_70 : f32 to vector<16x16xf32>
    %132 = arith.minimumf %131, %130 : vector<16x16xf32>
    %133 = math.roundeven %132 : vector<16x16xf32>
    %cst_71 = arith.constant 0.00784313772 : f32
    %134 = vector.broadcast %cst_71 : f32 to vector<16x16xf32>
    %135 = arith.mulf %133, %134 : vector<16x16xf32>
    %cst_72 = arith.constant 1.000000e+00 : f32
    %136 = vector.broadcast %cst_72 : f32 to vector<16x16xf32>
    %137 = arith.subf %135, %136 : vector<16x16xf32>
    %cst_73 = arith.constant -1.000000e+00 : f32
    %cst_74 = arith.constant 1.000000e+00 : f32
    %138 = vector.broadcast %cst_73 : f32 to vector<16x16xf32>
    %139 = arith.maximumf %138, %137 : vector<16x16xf32>
    %140 = vector.broadcast %cst_74 : f32 to vector<16x16xf32>
    %141 = arith.minimumf %140, %139 : vector<16x16xf32>
    %142 = arith.index_cast %c0_i32 : i32 to index
    %c2 = arith.constant 2 : index
    %c0_75 = arith.constant 0 : index
    %c0_76 = arith.constant 0 : index
    %143 = vector.load %arg16[%142, %c2, %c0_75, %c0_76] : memref<1x3x16x16xf32, #tpu.memory_space<vmem>>, vector<1x1x16x16xf32>
    %144 = vector.shape_cast %143 : vector<1x1x16x16xf32> to vector<16x16xf32>
    %145 = vector.shape_cast %141 : vector<16x16xf32> to vector<1x1x16x16xf32>
    tpu.vector_store %arg16[%142, %c2, %c0_75, %c0_76], %145 {strides = array<i32>} : memref<1x3x16x16xf32, #tpu.memory_space<vmem>>, vector<1x1x16x16xf32>,
    %c1_i32 = arith.constant 1 : i32
    return
  }
  func.func @transform_0(%arg0: i32, %arg1: i32, %arg2: i32) -> (i32, i32, i32, i32) {
    %c0_i32 = arith.constant 0 : i32
    %c0_i32_0 = arith.constant 0 : i32
    return %arg0, %c0_i32, %arg1, %arg2 : i32, i32, i32, i32
  }
  func.func @transform_1(%arg0: i32, %arg1: i32, %arg2: i32) -> (i32, i32) {
    %c0_i32 = arith.constant 0 : i32
    %c0_i32_0 = arith.constant 0 : i32
    %c0_i32_1 = arith.constant 0 : i32
    return %c0_i32, %c0_i32_0 : i32, i32
  }
  func.func @transform_2(%arg0: i32, %arg1: i32, %arg2: i32) -> (i32, i32) {
    %c0_i32 = arith.constant 0 : i32
    %c0_i32_0 = arith.constant 0 : i32
    %c0_i32_1 = arith.constant 0 : i32
    return %c0_i32, %c0_i32_0 : i32, i32
  }
  func.func @transform_3(%arg0: i32, %arg1: i32, %arg2: i32) -> (i32, i32) {
    %c0_i32 = arith.constant 0 : i32
    %c0_i32_0 = arith.constant 0 : i32
    %c0_i32_1 = arith.constant 0 : i32
    return %c0_i32, %c0_i32_0 : i32, i32
  }
  func.func @transform_4(%arg0: i32, %arg1: i32, %arg2: i32) -> (i32, i32) {
    %c0_i32 = arith.constant 0 : i32
    %c0_i32_0 = arith.constant 0 : i32
    %c0_i32_1 = arith.constant 0 : i32
    return %c0_i32, %c0_i32_0 : i32, i32
  }
  func.func @transform_5(%arg0: i32, %arg1: i32, %arg2: i32) -> (i32, i32) {
    %c0_i32 = arith.constant 0 : i32
    %c0_i32_0 = arith.constant 0 : i32
    %c0_i32_1 = arith.constant 0 : i32
    return %c0_i32, %c0_i32_0 : i32, i32
  }
  func.func @transform_6(%arg0: i32, %arg1: i32, %arg2: i32) -> (i32, i32) {
    %c0_i32 = arith.constant 0 : i32
    %c0_i32_0 = arith.constant 0 : i32
    %c0_i32_1 = arith.constant 0 : i32
    return %c0_i32, %c0_i32_0 : i32, i32
  }
  func.func @transform_7(%arg0: i32, %arg1: i32, %arg2: i32) -> (i32, i32) {
    %c0_i32 = arith.constant 0 : i32
    %c0_i32_0 = arith.constant 0 : i32
    %c0_i32_1 = arith.constant 0 : i32
    return %c0_i32, %c0_i32_0 : i32, i32
  }
  func.func @transform_8(%arg0: i32, %arg1: i32, %arg2: i32) -> (i32, i32) {
    %c0_i32 = arith.constant 0 : i32
    %c0_i32_0 = arith.constant 0 : i32
    %c0_i32_1 = arith.constant 0 : i32
    return %c0_i32, %c0_i32_0 : i32, i32
  }
  func.func @transform_9(%arg0: i32, %arg1: i32, %arg2: i32) -> (i32, i32) {
    %c0_i32 = arith.constant 0 : i32
    %c0_i32_0 = arith.constant 0 : i32
    %c0_i32_1 = arith.constant 0 : i32
    return %c0_i32, %c0_i32_0 : i32, i32
  }
  func.func @transform_10(%arg0: i32, %arg1: i32, %arg2: i32) -> (i32, i32) {
    %c0_i32 = arith.constant 0 : i32
    %c0_i32_0 = arith.constant 0 : i32
    %c0_i32_1 = arith.constant 0 : i32
    return %c0_i32, %c0_i32_0 : i32, i32
  }
  func.func @transform_11(%arg0: i32, %arg1: i32, %arg2: i32) -> (i32, i32) {
    %c0_i32 = arith.constant 0 : i32
    %c0_i32_0 = arith.constant 0 : i32
    %c0_i32_1 = arith.constant 0 : i32
    return %c0_i32, %c0_i32_0 : i32, i32
  }
  func.func @transform_12(%arg0: i32, %arg1: i32, %arg2: i32) -> (i32, i32) {
    %c0_i32 = arith.constant 0 : i32
    %c0_i32_0 = arith.constant 0 : i32
    %c0_i32_1 = arith.constant 0 : i32
    return %c0_i32, %c0_i32_0 : i32, i32
  }
  func.func @transform_13(%arg0: i32, %arg1: i32, %arg2: i32) -> (i32, i32, i32, i32) {
    %c0_i32 = arith.constant 0 : i32
    %c0_i32_0 = arith.constant 0 : i32
    return %arg0, %c0_i32, %arg1, %arg2 : i32, i32, i32, i32
  }
}

</mosaic_0001>

<bundles_post_ra>
// kernel: tpu_custom_call.1
= control target key start
LH: loop header
LB: loop body
LE: loop exit
PB: predicated region body
PF: predicated region fallthrough
CT: control target
= control target key end

     0   :  { %s2270_s0 = inlined_call_operand.hbm [shape: f32[2,3,16,16], index: 0, kind: input, shape index: {}]   ;;  %s2271_s1 = inlined_call_operand.hbm [shape: bf16[16,16], index: 1, kind: input, shape index: {}]   ;;  %s2272_s2 = inlined_call_operand.hbm [shape: bf16[16,16], index: 2, kind: input, shape index: {}]   ;;  %s2273_s3 = inlined_call_operand.hbm [shape: bf16[16,16], index: 3, kind: input, shape index: {}]   ;;  %s2274_s4 = inlined_call_operand.vmem [shape: bf16[16,16], index: 4, kind: input, shape index: {}]   ;;  %s2275_s5 = inlined_call_operand.hbm [shape: bf16[8,16], index: 5, kind: input, shape index: {}]   ;;  %s2276_s6 = inlined_call_operand.vmem [shape: bf16[32,16], index: 6, kind: input, shape index: {}]   ;;  %s2277_s7 = inlined_call_operand.vmem [shape: bf16[16,8], index: 7, kind: input, shape index: {}]   ;;  %s2278_s8 = inlined_call_operand.vmem [shape: bf16[16,32], index: 8, kind: input, shape index: {}]   ;;  %s2279_s9 = inlined_call_operand.vmem [shape: f32[16,16], index: 9, kind: input, shape index: {}]   ;;  %s2280_s10 = inlined_call_operand.vmem [shape: f32[16,16], index: 10, kind: input, shape index: {}]   ;;  %s2281_s11 = inlined_call_operand.vmem [shape: f32[8,16], index: 11, kind: input, shape index: {}]   ;;  %s2282_s12 = inlined_call_operand.vmem [shape: f32[8,16], index: 12, kind: input, shape index: {}]   ;;  %s2283_s13 = inlined_call_operand.hbm [shape: f32[2,3,16,16], index: 13, kind: output, shape index: {}]  }
   0x1   :  { %2293 = sst [smem:[#allocation19_spill]] %s2276_s6 }
   0x2   :  { %2294 = sst [smem:[#allocation20_spill]] %s2277_s7 }
   0x3   :  { %2295 = sst [smem:[#allocation21_spill]] %s2278_s8 }
   0x4   :  { %2296 = sst [smem:[#allocation22_spill]] %s2279_s9 }
   0x5   :  { %2297 = sst [smem:[#allocation23_spill]] %s2281_s11 }
   0x6   :  { %2298 = sst [smem:[#allocation24_spill]] %s2282_s12 }
   0x7   :  { %2299 = sst [smem:[#allocation25_spill]] %s2283_s13 }
   0x8   :  { %18 = vsyncpa [#allocation3], 0 }
   0x9   :  { %20 = vsyncpa [#allocation3 + $0x1], 0 }
   0xa   :  { %21 = vsyncpa [#allocation6], 0 }
   0xb   :  { %22 = vsyncpa [#allocation9], 0 }
   0xc   :  { %23 = vsyncpa [#allocation4], 0 }
   0xd   :  { %25 = vsyncpa [#allocation4 + $0x1], 0  ;;  %s1880_s25 = smov 0   ;;  %s1882_s26 = smov 0  }
   0xe   :  { %s1884_s27 = smov 0   ;;  %s1886_s28 = smov 0  }
   0xf   :  { %s1888_s29 = smov 0   ;;  %s1890_s30 = smov 0  }
  0x10 LB: > { %2300 = sst [smem:[#allocation16_spill]] %s1772_s25  ;;  %s1297_s14 = sadd.s32 4294967295, %s1792_s30   ;;  %s1792_s30 = sphi %s1890_s30, %s31_s30   ;;  %s1788_s29 = sphi %s1888_s29, %s2332_s29   ;;  %s1784_s28 = sphi %s1886_s28, %s2331_s28   ;;  %s1780_s27 = sphi %s1884_s27, %s2330_s27   ;;  %s1776_s26 = sphi %s1882_s26, %s2329_s26   ;;  %s1772_s25 = sphi %s1880_s25, %s2328_s25  }
  0x11   : > { %2301 = sst [smem:[#allocation17_spill]] %s1784_s28  ;;  %s1298_s15 = sadd.s32 4294967294, %s1792_s30  }
  0x12   : > { %p74_p0 = scmp.ne.s32.totalorder %s1776_s26, %s1772_s25  ;;  %p1914_p1 = scmp.eq.s32.totalorder %s1297_s14, 0 }
  0x13   : > { %p1918_p2 = scmp.eq.s32.totalorder %s1297_s14, 1  ;;  %p360_p3 = scmp.eq.s32.totalorder %s1298_s15, 1 }
  0x14   : > { %s2302_s16 = scalar_select %p1914_p1, 1, 0 }
  0x15   : > { %s2303_s17 = scalar_select %p1918_p2, 1, 0 }
  0x16   : > { %p1924_p4 = por %p1914_p1, %p74_p0  ;;  %p1299_p5 = scmp.ge.s32.totalorder %s1792_s30, 1 }
  0x17   : > { %p1929_p6 = por %p360_p3, %p74_p0  ;;  %p367_p7 = scmp.lt.s32.totalorder %s1792_s30, 3 }
  0x18   : > { %s2304_s18 = scalar_select %p1924_p4, 1, 0 }
  0x19   : > { %s2305_s19 = scalar_select %p1929_p6, 1, 0 }
  0x1a   : > { %p1934_p8 = pnand %p1299_p5, %p367_p7  ;;  %s1794_s21 = smov [#allocation5]  }
  0x1b   : > { %2306 = sst [smem:[#allocation18_spill]] %s2305_s19  ;;  %s379_s22 = sshll.u32 %s1794_s21, 4  ;;  %s1938_s22 = int_to_ptr.vmem [resolvable:$true] %s379_s22 }
  0x1c   : > { %s2307_s20 = scalar_select %p1934_p8, 1, 0 }
  0x1d   : > { %p1454_p9 = pneg %p1934_p8  ;;  %s1795_s24 = smov [#allocation8]  }
  0x1e   : > { %s405_s14 = sshll.u32 %s1795_s24, 4  ;;  %s1796_s15 = smov [#allocation7]   ;;  %s1949_s14 = int_to_ptr.vmem [resolvable:$true] %s405_s14 }
  0x1f   : > { %p1945_p11 = pnand %p1454_p9, %p1914_p1  ;;  %s1951_s19 = sshll.u32 %s1796_s15, 4  ;;  %s393_s19 = int_to_ptr.vmem [resolvable:$true] %s1951_s19 }
  0x20   : > { %s1560_s13 = scalar_lea.hbm %s2271_s1, 128 }
  0x21   : > { %p1561_p12 = scmp.ne.s32.totalorder %s2271_s1, %s1560_s13  ;;  %p1961_p13 = pneg %p1945_p11 }
  0x22   : > { %p1567_p5 = scmp.lt.u32.totalorder %s1560_s13, %s2271_s1 }
  0x23   : > { %p1563_p0 = pnand %p1961_p13, %p1561_p12 }
  0x25   : > { %p1564_p3 = pneg %p1563_p0 }
  0x27   : > { %p1569_p7 = pnand %p1567_p5, %p1564_p3 }
  0x29   : > { %1572 = shalt.err (!%p1569_p7)
}
  0x2a   : > { %s1573_s7 = scalar_lea.vmem %s1938_s22, 128  ;;  %p1581_p1 = scmp.lt.s32.totalorder %s1938_s22, %s1938_s22 }
  0x2b   : > { %p1574_p9 = scmp.ne.s32.totalorder %s1938_s22, %s1573_s7  ;;  %p1582_p4 = scmp.lt.s32.totalorder %s1573_s7, %s1573_s7 }
  0x2d   : > { %p1576_p10 = pnand %p1574_p9, %p1961_p13  ;;  %p1583_p12 = por %p1582_p4, %p1581_p1 }
  0x2f   : > { %p1577_p6 = pneg %p1576_p10 }
  0x31   : > { %p1584_p0 = pnand %p1583_p12, %p1577_p6 }
  0x33   : > { %1587 = shalt.err (!%p1584_p0)
}
  0x34   : > { %s1797_s25 = smov 64   ;;  %s1798_s13 = smov 4  }
  0x35   : > { %1457 = dma.hbm_to_vmem [thread:$0]  (!%p1945_p11), %s2271_s1, 128, %s1938_s22, [#allocation6], %s1797_s25, %s1797_s25, %s1798_s13  }
  0x36   : > { %s1588_s7 = scalar_lea.hbm %s2273_s3, 128 }
  0x37   : > { %p1589_p1 = scmp.ne.s32.totalorder %s2273_s3, %s1588_s7  ;;  %p1595_p10 = scmp.lt.u32.totalorder %s1588_s7, %s2273_s3 }
  0x39   : > { %p1591_p4 = pnand %p1589_p1, %p1961_p13 }
  0x3b   : > { %p1592_p6 = pneg %p1591_p4 }
  0x3d   : > { %p1597_p3 = pnand %p1595_p10, %p1592_p6 }
  0x3f   : > { %1600 = shalt.err (!%p1597_p3)
}
  0x40   : > { %s1601_s22 = scalar_lea.vmem %s1949_s14, 128  ;;  %p1609_p12 = scmp.lt.s32.totalorder %s1949_s14, %s1949_s14 }
  0x41   : > { %p1602_p5 = scmp.ne.s32.totalorder %s1949_s14, %s1601_s22  ;;  %p1610_p0 = scmp.lt.s32.totalorder %s1601_s22, %s1601_s22 }
  0x43   : > { %p1604_p7 = pnand %p1602_p5, %p1961_p13  ;;  %p1611_p1 = por %p1610_p0, %p1609_p12 }
  0x45   : > { %p1605_p9 = pneg %p1604_p7 }
  0x47   : > { %p1612_p4 = pnand %p1611_p1, %p1605_p9 }
  0x49   : > { %1615 = shalt.err (!%p1612_p4)
}
  0x4a   : > { %1463 = dma.hbm_to_vmem [thread:$0]  (!%p1945_p11), %s2273_s3, 128, %s1949_s14, [#allocation9], %s1797_s25, %s1797_s25, %s1798_s13  }
  0x4b   : > { %s1616_s28 = scalar_lea.hbm %s2272_s2, 128 }
  0x4c   : > { %p1617_p6 = scmp.ne.s32.totalorder %s2272_s2, %s1616_s28  ;;  %p1623_p5 = scmp.lt.u32.totalorder %s1616_s28, %s2272_s2 }
  0x4e   : > { %p1619_p10 = pnand %p1617_p6, %p1961_p13 }
  0x50   : > { %p1620_p3 = pneg %p1619_p10 }
  0x52   : > { %p1625_p7 = pnand %p1623_p5, %p1620_p3 }
  0x54   : > { %1628 = shalt.err (!%p1625_p7)
}
  0x55   : > { %s1629_s22 = scalar_lea.vmem %s393_s19, 128  ;;  %p1637_p1 = scmp.lt.s32.totalorder %s393_s19, %s393_s19 }
  0x56   : > { %p1630_p9 = scmp.ne.s32.totalorder %s393_s19, %s1629_s22  ;;  %p1638_p4 = scmp.lt.s32.totalorder %s1629_s22, %s1629_s22 }
  0x58   : > { %p1632_p12 = pnand %p1630_p9, %p1961_p13  ;;  %p1639_p8 = por %p1638_p4, %p1637_p1 }
  0x5a   : > { %p1633_p0 = pneg %p1632_p12 }
  0x5c   : > { %p1640_p2 = pnand %p1639_p8, %p1633_p0 }
  0x5e   : > { %1643 = shalt.err (!%p1640_p2)
}
  0x5f   : > { %1460 = dma.hbm_to_vmem [thread:$0]  (!%p1945_p11), %s2272_s2, 128, %s393_s19, [#allocation6], %s1797_s25, %s1797_s25, %s1798_s13  }
  0x60   : > { %s1799_s8 = smov [#allocation10]   ;;  %s1644_s21 = scalar_lea.hbm %s2275_s5, 64 }
  0x61   : > { %s422_s9 = sshll.u32 %s1799_s8, 4  ;;  %p1645_p2 = scmp.ne.s32.totalorder %s2275_s5, %s1644_s21  ;;  %s423_s9 = int_to_ptr.vmem [resolvable:$true] %s422_s9 }
  0x62   : > { %p1651_p10 = scmp.lt.u32.totalorder %s1644_s21, %s2275_s5 }
  0x63   : > { %p1647_p8 = pnand %p1645_p2, %p1961_p13 }
  0x65   : > { %p1648_p6 = pneg %p1647_p8 }
  0x67   : > { %p1653_p3 = pnand %p1651_p10, %p1648_p6 }
  0x69   : > { %1656 = shalt.err (!%p1653_p3)
}
  0x6a   : > { %s1657_s19 = scalar_lea.vmem %s423_s9, 64  ;;  %p1665_p12 = scmp.lt.s32.totalorder %s423_s9, %s423_s9 }
  0x6b   : > { %p1658_p5 = scmp.ne.s32.totalorder %s423_s9, %s1657_s19  ;;  %p1666_p0 = scmp.lt.s32.totalorder %s1657_s19, %s1657_s19 }
  0x6d   : > { %p1660_p7 = pnand %p1658_p5, %p1961_p13  ;;  %p1667_p1 = por %p1666_p0, %p1665_p12 }
  0x6f   : > { %p1661_p9 = pneg %p1660_p7 }
  0x71   : > { %p1668_p4 = pnand %p1667_p1, %p1661_p9 }
  0x73   : > { %1671 = shalt.err (!%p1668_p4)
}
  0x74   : > { %1466 = dma.hbm_to_vmem [thread:$0]  (!%p1945_p11), %s2275_s5, 64, %s423_s9, [#allocation9]  }
  0x75   : > { %s50_s11 = sadd.s32 1, %s1788_s29  ;;  %s61_s14 = sadd.s32 1, %s1780_s27 }
  0x76   : > { %p52_p13 = scmp.ge.s32.totalorder %s50_s11, 2  ;;  %p68_p2 = scmp.ne.s32.totalorder %s1780_s27, %s1776_s26 }
  0x77   : > { %p69_p8 = scmp.eq.s32.totalorder %s1792_s30, 0  ;;  %p1479_p6 = scmp.lt.s32.totalorder %s1792_s30, 2 }
  0x78   : > { %s2334_s11 = smov (%p52_p13, %s50_s11), 0  ;;  %p2310_p3 = scmp.ne.s32.totalorder %s2303_s17, 0 }
  0x79   : > { %p70_p10 = por %p69_p8, %p68_p2  ;;  %s54_s6 = ssub.s32 %s1788_s29, %s2334_s11 }
  0x7a   : > { %p2061_p5 = por %p2310_p3, %p68_p2  ;;  %s454_s8 = sand.u32 1, %s1780_s27  }
  0x7b   : > { %p59_p7 = scmp.eq.s32.totalorder %s54_s6, 0  ;;  %s1421_s9 = smul.u32 48, %s454_s8 }
  0x7c   : > { %p2068_p11 = pnand %p1479_p6, %p70_p10  ;;  %s1422_s21 = smul.u32 768, %s1788_s29 }
  0x7d   : > { %s2073_s28 = scalar_select %p59_p7, %s1780_s27, %s61_s14  }
  0x7e   : > { %s458_s24 = scalar_lea.vmem [#allocation2], %s1421_s9  ;;  %s2079_s22 = scalar_lea.hbm %s2270_s0, %s1422_s21 }
  0x7f   : > { %s468_s15 = sshll.u32 %s458_s24, 4  ;;  %s2083_s19 = scalar_lea.sflag [#allocation3], %s454_s8  ;;  %s2081_s15 = int_to_ptr.vmem [resolvable:$true] %s468_s15 }
  0x80   : > { %s1672_s25 = scalar_lea.hbm %s2079_s22, 768  ;;  %p1674_p12 = pneg %p2068_p11 }
  0x81   : > { %p1673_p9 = scmp.ne.s32.totalorder %s2079_s22, %s1672_s25  ;;  %s1677_s6 = scalar_lea.hbm %s2270_s0, 1536 }
  0x82   : > { %p1678_p4 = scmp.lt.u32.totalorder %s2079_s22, %s2270_s0  ;;  %p1679_p13 = scmp.lt.u32.totalorder %s1677_s6, %s1672_s25 }
  0x83   : > { %p1675_p0 = pnand %p1674_p12, %p1673_p9  ;;  %p1681_p8 = scmp.lt.u32.totalorder %s1672_s25, %s2079_s22 }
  0x84   : > { %p1680_p2 = por %p1679_p13, %p1678_p4 }
  0x85   : > { %p1676_p1 = pneg %p1675_p0 }
  0x86   : > { %p1682_p6 = por %p1681_p8, %p1680_p2 }
  0x88   : > { %p1683_p10 = pnand %p1682_p6, %p1676_p1 }
  0x8a   : > { %1686 = shalt.err (!%p1683_p10)
}
  0x8b   : > { %s1687_s8 = scalar_lea.vmem %s2081_s15, 768  ;;  %s1800_s24 = smov [#allocation2]  }
  0x8c   : > { %p1688_p3 = scmp.ne.s32.totalorder %s2081_s15, %s1687_s8  ;;  %s1692_s17 = sshll.u32 %s1800_s24, 4  ;;  %s1693_s17 = int_to_ptr.vmem [resolvable:$false] %s1692_s17 }
  0x8d   : > { %s1694_s7 = scalar_lea.vmem %s1693_s17, 1536  ;;  %p1695_p0 = scmp.lt.s32.totalorder %s2081_s15, %s1693_s17 }
  0x8e   : > { %p1690_p7 = pnand %p1688_p3, %p1674_p12  ;;  %p1696_p4 = scmp.lt.s32.totalorder %s1694_s7, %s1687_s8 }
  0x90   : > { %p1691_p9 = pneg %p1690_p7  ;;  %p1697_p13 = por %p1696_p4, %p1695_p0 }
  0x92   : > { %p1698_p2 = pnand %p1697_p13, %p1691_p9 }
  0x94   : > { %1701 = shalt.err (!%p1698_p2)
}
  0x95   : > { %s1801_s25 = smov 128   ;;  %s1802_s13 = smov 8  }
  0x96   : > { %1470 = dma.hbm_to_vmem [thread:$0]  (!%p2068_p11), %s2079_s22, 768, %s2081_s15, %s2083_s19, %s1801_s25, %s1801_s25, %s1802_s13  }
  0x97   : > { %p2313_p12 = scmp.ne.s32.totalorder %s2307_s20, 0 }
  0x98   : > { %s2114_s14 = sand.u32 (!%p2313_p12), 1, %s1776_s26   ;;  %p2314_p1 = scmp.ne.s32.totalorder (!%p2313_p12), %s2304_s18, 0 }
  0x99   : > { %480 = sbr.rel (%p2313_p12) target bundleno = 1656 (0x678), region = 72  ;;  %s483_s9 = scalar_lea.sflag (!%p2313_p12), [#allocation3], %s2114_s14 }
  0x9a   : > { %s1423_s6 = smul.u32 (!%p2313_p12), 48, %s2114_s14 }
  0x9c   : > { %s486_s21 = scalar_lea.vmem (!%p2313_p12), [#allocation2], %s1423_s6 }
  0xa0   : > { %1755 = dma.done.wait (%p2314_p1), %s483_s9, 768  }
  0xa1   : > { %1757 = vsyncadd (%p2314_p1), %s483_s9, 4294966528  ;;  %p2315_p11 = scmp.ne.s32.totalorder %s2302_s16, 0 }
  0xa3   : > { %1759 = dma.done.wait (%p2315_p11), [#allocation6], 256  }
  0xa4   : > { %1761 = vsyncadd (%p2315_p11), [#allocation6], 4294967040 }
  0xa5   : > { %1763 = dma.done.wait (%p2315_p11), [#allocation9], 192  }
  0xa6   : > { %1765 = vsyncadd (%p2315_p11), [#allocation9], 4294967104  ;;  %v1803_v0 = vmov 0.0   ;;  %vm1804_vm0 = vmmov 0   ;;  %v1552_v1 = vld [vmem:[%s2274_s4] sm:$0xff]   ;;  %v549_v3 = vld [vmem:[%s486_s21 + $0x8] sm:$0xff] }
  0xa7   : > { %1371 = vmatprep.subr.bf16.mxu0 %v1803_v0  ;;  %1373 = vmatprep.mubr.msk.bf16.mxu0 %vm1804_vm0, %v1803_v0  ;;  %v548_v2 = vld [vmem:[%s486_s21] sm:$0xff]  ;;  %v550_v4 = vld [vmem:[%s486_s21 + $0x10] sm:$0xff]  ;;  %v551_v5 = vld [vmem:[%s486_s21 + $0x18] sm:$0xff]  ;;  %v1312_v9 = vclamps-f32 %v549_v3, 1.0  ;;  %vm627_vm1 = vcmask 130048   ;;  %s1805_s16 = smov 16  }
  0xa8   : > { %1377 = vmatprep.subr.bf16.mxu1 %v1803_v0  ;;  %1379 = vmatprep.mubr.msk.bf16.mxu1 %vm1804_vm0, %v1803_v0  ;;  %v552_v6 = vld [vmem:[%s486_s21 + $0x20] sm:$0xff]  ;;  %v553_v7 = vld [vmem:[%s486_s21 + $0x28] sm:$0xff]  ;;  %v1311_v8 = vclamps-f32 %v548_v2, 1.0  ;;  %v1313_v10 = vclamps-f32 %v550_v4, 1.0  ;;  %v1314_v11 = vclamps-f32 %v551_v5, 1.0  ;;  %s2316_s17 = sld [smem:[#allocation22_spill]] }
  0xa9   : > { %1372 = vmatpush3.bf16.msra.mxu0 %v1552_v1  ;;  %v1315_v12 = vclamps-f32 %v552_v6, 1.0  ;;  %v1316_v13 = vclamps-f32 %v553_v7, 1.0  ;;  %v567_v15 = vadd.f32 1.0, %v1312_v9  ;;  %v1553_v61 = vld [vmem:[#allocation5] sm:$0xff]   ;;  %v1554_v62 = vld [vmem:[#allocation8] sm:$0xff]   ;;  %v723_v4 = vld [vmem:[%s2280_s10 + $0x8] sm:$0xff] }
  0xaa   : > { %1383 = vmatprep.subr.bf16.mxu0 %v1803_v0  ;;  %v566_v14 = vadd.f32 1.0, %v1311_v8  ;;  %v568_v16 = vadd.f32 1.0, %v1313_v10  ;;  %v569_v17 = vadd.f32 1.0, %v1314_v11  ;;  %v722_v63 = vld [vmem:[%s2280_s10] sm:$0xff]  ;;  %s2317_s21 = sld [smem:[#allocation19_spill]]  ;;  %vm865_vm2 = vcmask 261120  }
  0xab   : > { %v570_v18 = vadd.f32 1.0, %v1315_v12  ;;  %v571_v19 = vadd.f32 1.0, %v1316_v13  ;;  %v573_v21 = vmul.f32 127.5, %v567_v15  ;;  %s2318_s15 = sld [smem:[#allocation21_spill]]  ;;  %s2319_s8 = sld [smem:[#allocation24_spill]]  ;;  %vm1023_vm3 = vcmask 1043456  }
  0xac   : > { %v572_v20 = vmul.f32 127.5, %v566_v14  ;;  %v574_v22 = vmul.f32 127.5, %v568_v16  ;;  %v575_v23 = vmul.f32 127.5, %v569_v17  ;;  %s2320_s25 = sld [smem:[#allocation23_spill]]  ;;  %s2321_s18 = sld [smem:[#allocation20_spill]]  ;;  %vm1019_vm4 = vcmask 64512  }
  0xad   : > { %v576_v24 = vmul.f32 127.5, %v570_v18  ;;  %v577_v25 = vmul.f32 127.5, %v571_v19  ;;  %v579_v27 = vfloor.f32 %v573_v21  ;;  %s1806_s20 = smov 112   ;;  %s1151_s7 = scalar_lea.sflag [#allocation4], %s2114_s14 }
  0xae   : > { %v578_v26 = vfloor.f32 %v572_v20  ;;  %v580_v28 = vfloor.f32 %v574_v22  ;;  %v581_v29 = vfloor.f32 %v575_v23  ;;  %v728_v13 = vld [vmem:[%s2316_s17] sm:$0xff]  ;;  %v729_v14 = vld [vmem:[%s2316_s17 + $0x8] sm:$0xff]  ;;  %s1807_s13 = smov [#allocation11]  }
  0xaf   : > { %v582_v30 = vfloor.f32 %v576_v24  ;;  %v583_v31 = vfloor.f32 %v577_v25  ;;  %v585_v33 = vmul.f32 0.299, %v579_v27  ;;  %v607_v46 = vmul.f32 0.5, %v579_v27  ;;  %s1706_s9 = sshll.u32 %s1807_s13, 4  ;;  %s1707_s9 = int_to_ptr.vmem [resolvable:$false] %s1706_s9 }
  0xb0   : > { %v584_v32 = vmul.f32 0.299, %v578_v26  ;;  %v586_v34 = vmul.f32 0.587, %v580_v28  ;;  %v587_v35 = vmul.f32 0.587, %v581_v29 }
  0xb1   : > { %v590_v36 = vmul.f32 0.114, %v582_v30  ;;  %v591_v37 = vmul.f32 0.114, %v583_v31  ;;  %v606_v45 = vmul.f32 0.5, %v578_v26  ;;  %v602_v16 = vmul.f32 0.5, %v582_v30 }
  0xb2   : > { %v588_v38 = vadd.f32 %v586_v34, %v584_v32  ;;  %v589_v39 = vadd.f32 %v587_v35, %v585_v33  ;;  %v608_v47 = vmul.f32 0.418688, %v580_v28  ;;  %v609_v48 = vmul.f32 0.418688, %v581_v29  ;;  %v1555_v23 = vld [vmem:[%s2317_s21] sm:$0xff]  }
  0xb3   : > { %v612_v49 = vmul.f32 0.081312, %v582_v30  ;;  %v613_v50 = vmul.f32 0.081312, %v583_v31  ;;  %v597_v1 = vmul.f32 -0.168736, %v579_v27 }
  0xb4   : > { %v592_v40 = vadd.f32 %v590_v36, %v588_v38  ;;  %v593_v41 = vadd.f32 %v591_v37, %v589_v39  ;;  %v610_v51 = vsub.f32 %v606_v45, %v608_v47  ;;  %v611_v52 = vsub.f32 %v607_v46, %v609_v48  ;;  %v1557_v38 = vld [vmem:[#allocation7] sm:$0xff]   ;;  %v1558_v45 = vld [vmem:[%s2318_s15] sm:$0xff]  }
  0xb5   : > { %v598_v2 = vmul.f32 0.331264, %v580_v28  ;;  %v599_v5 = vmul.f32 0.331264, %v581_v29  ;;  %v596_v6 = vmul.f32 -0.168736, %v578_v26 }
  0xb6   : > { %v1317_v42 = vadd.f32 -128.0, %v592_v40  ;;  %v1318_v43 = vadd.f32 -128.0, %v593_v41  ;;  %v614_v53 = vsub.f32 %v610_v51, %v612_v49  ;;  %v615_v54 = vsub.f32 %v611_v52, %v613_v50  ;;  %v954_v50 = vld [vmem:[%s2319_s8] sm:$0xff]  ;;  %s2323_s8 = sld [smem:[#allocation25_spill]] }
  0xb7   : > { %v601_v15 = vsub.f32 %v597_v1, %v599_v5  ;;  %v603_v17 = vmul.f32 0.5, %v583_v31  ;;  %v600_v18 = vsub.f32 %v596_v6, %v598_v2  ;;  %v1556_v31 = vld [vmem:[%s2317_s21 + $0x8] sm:$0xff]   ;;  %v1559_v2 = vld [vmem:[%s2321_s18] sm:$0xff]   ;;  %s1708_s18 = scalar_lea.vmem %s1707_s9, 1536 }
  0xb8   : > { %v620_v44 = vpack.c.bf16 %v1318_v43, %v1317_v42  ;;  %v1547_v55 = vpack.i.bf16 %v615_v54, %v614_v53 }
  0xb9   : > { %v605_v24 = vadd.f32 %v603_v17, %v601_v15  ;;  %v604_v27 = vadd.f32 %v602_v16, %v600_v18 }
  0xba   : > { %1374 = vmatmul.mubr.msk.bf16.vlgmr.msra.gmra.mrb[0].mxu0 %vm627_vm1, %v620_v44  ;;  %1548 = vrot.lane.b32.xlu0 %v1547_v55, %s1805_s16  ;;  %v847_v44 = vld [vmem:[#allocation10] sm:$0xf]  ;;  %s2200_s16 = scalar_lea.vmem [#allocation11], %s1423_s6  ;;  %s2322_s6 = sld [smem:[#allocation17_spill]] }
  0xbb   : > { %1385 = vmatprep.mubr.msk.bf16.mxu0 %vm1804_vm0, %v1803_v0  ;;  %1384 = vmatpush3.bf16.msra.mxu0 %v1554_v62  ;;  %s1167_s15 = sshll.u32 %s2200_s16, 4  ;;  %s2217_s15 = int_to_ptr.vmem [resolvable:$true] %s1167_s15 }
  0xbc   : > { %1395 = vmatprep.subr.bf16.mxu0 %v1803_v0  ;;  %p1709_p3 = scmp.lt.s32.totalorder %s2217_s15, %s1707_s9 }
  0xc0   : > { %s1433_s12 = smul.u32 768, %s2322_s6 }
  0xc2   : > { %s2215_s24 = scalar_lea.hbm %s2323_s8, %s1433_s12 }
 0x12c   : > { %v1549_v20 = vpop.permute.xlu0 %1548 }
 0x12d   : > { %v1551_v25 = vunpack.i.h.bf16 %v1549_v20  ;;  %v1550_v26 = vunpack.i.l.bf16 %v1549_v20 }
 0x12f   : > { %v846_v29 = vsel %vm627_vm1, %v605_v24, %v1551_v25  ;;  %v845_v30 = vsel %vm627_vm1, %v604_v27, %v1550_v26 }
 0x130   : > { %v852_v32 = vpack.c.bf16 %v846_v29, %v845_v30 }
 0x18d   : > { %v665_v56 = vpop.f32.mrb[0].mxu0 }
 0x18e   : > { %v1375_v57 = vpop.f32.mrb[1].mxu0 }
 0x18f   : > { %v668_v58 = vpop.f32.mrb[2].mxu0 }
 0x190   : > { %v672_v59 = vpack.c.bf16 %v668_v58, %v665_v56  ;;  %v1376_v60 = vpop.f32.mrb[3].mxu0 }
 0x192   : > { %1378 = vmatpush3.bf16.msra.mxu1 %v672_v59 }
 0x193   : > { %1389 = vmatprep.subr.bf16.mxu1 %v1803_v0 }
 0x195   : > { %1380 = vmatmul.mubr.msk.bf16.vlgmr.msra.gmra.mrb[0].mxu1 %vm627_vm1, %v1553_v61 }
 0x196   : > { %1391 = vmatprep.mubr.msk.bf16.mxu1 %vm1804_vm0, %v1803_v0 }
 0x268   : > { %v715_v3 = vpop.f32.mrb[0].mxu1 }
 0x269   : > { %v724_v7 = vmul.f32 %v722_v63, %v715_v3  ;;  %v1381_v8 = vpop.f32.mrb[1].mxu1 }
 0x26a   : > { %v718_v9 = vpop.f32.mrb[2].mxu1 }
 0x26b   : > { %v1424_v10 = vround.rtne.f32 %v724_v7  ;;  %v725_v11 = vmul.f32 %v723_v4, %v718_v9  ;;  %v1382_v12 = vpop.f32.mrb[3].mxu1 }
 0x26d   : > { %v1425_v19 = vround.rtne.f32 %v725_v11  ;;  %v730_v21 = vmul.f32 %v1424_v10, %v728_v13 }
 0x26f   : > { %v731_v22 = vmul.f32 %v1425_v19, %v729_v14 }
 0x271   : > { %v736_v28 = vpack.c.bf16 %v731_v22, %v730_v21 }
 0x273   : > { %1386 = vmatmul.mubr.msk.bf16.vlgmr.msra.gmra.mrb[4].mxu0 %vm627_vm1, %v736_v28 }
 0x274   : > { %1396 = vmatpush3.bf16.msra.mxu0 %v1555_v23  ;;  %1399 = vmatprep.mubr.msk.bf16.mxu0 %vm1804_vm0, %v1803_v0 }
 0x275   : > { %1397 = vmatprep.subr.bf16.mxu0 %v1803_v0 }
 0x278   : > { %1398 = vmatpush3.bf16.msra.mxu0 %v1556_v31 }
 0x279   : > { %1409 = vmatprep.subr.bf16.mxu0 %v1803_v0 }
 0x27b   : > { %1400 = vmatmul.mubr.msk.bf16.vlgmr.msra.gmra.mrb[8].mxu0 %vm865_vm2, %v852_v32 }
 0x27c   : > { %1411 = vmatprep.mubr.msk.bf16.mxu0 %vm1804_vm0, %v1803_v0  ;;  %1410 = vmatpush3.bf16.msra.mxu0 %v1558_v45 }
 0x346   : > { %v780_v33 = vpop.f32.mrb[4].mxu0 }
 0x347   : > { %v1387_v34 = vpop.f32.mrb[5].mxu0 }
 0x348   : > { %v783_v35 = vpop.f32.mrb[6].mxu0 }
 0x349   : > { %v787_v36 = vpack.c.bf16 %v783_v35, %v780_v33  ;;  %v1388_v37 = vpop.f32.mrb[7].mxu0 }
 0x34b   : > { %1390 = vmatpush3.bf16.msra.mxu1 %v787_v36 }
 0x34c   : > { %1403 = vmatprep.subr.bf16.mxu1 %v1803_v0 }
 0x34e   : > { %1392 = vmatmul.mubr.msk.bf16.vlgmr.msra.gmra.mrb[4].mxu1 %vm627_vm1, %v1557_v38  ;;  %v903_v39 = vpop.f32.mrb[8].mxu0 }
 0x34f   : > { %v1401_v40 = vpop.f32.mrb[9].mxu0  ;;  %1405 = vmatprep.mubr.msk.bf16.mxu1 %vm1804_vm0, %v1803_v0 }
 0x350   : > { %v906_v41 = vpop.f32.mrb[10].mxu0 }
 0x351   : > { %v910_v42 = vpack.c.bf16 %v906_v41, %v903_v39  ;;  %v1402_v43 = vpop.f32.mrb[11].mxu0 }
 0x353   : > { %1404 = vmatpush3.bf16.msra.mxu1 %v910_v42 }
 0x354   : > { %1415 = vmatprep.subr.bf16.mxu1 %v1803_v0 }
 0x356   : > { %1406 = vmatmul.mubr.msk.bf16.vlgmr.msra.gmra.mrb[8].mxu1 %vm627_vm1, %v847_v44 }
 0x357   : > { %1417 = vmatprep.mubr.msk.bf16.mxu1 %vm1804_vm0, %v1803_v0  ;;  %v957_v0 = vld [vmem:[%s2320_s25] sm:$0xff]  ;;  %s1702_s25 = scalar_lea.vmem %s2217_s15, 768 }
 0x358   : > { %p1703_p8 = scmp.ne.s32.totalorder %s2217_s15, %s1702_s25  ;;  %p1710_p7 = scmp.lt.s32.totalorder %s1708_s18, %s1702_s25 }
 0x35a   : > { %p1704_p6 = pnand %p1703_p8, %p2061_p5  ;;  %p1711_p9 = por %p1710_p7, %p1709_p3 }
 0x35c   : > { %p1705_p10 = pneg %p1704_p6 }
 0x35e   : > { %p1712_p0 = pnand %p1711_p9, %p1705_p10 }
 0x421   : > { %v830_v46 = vpop.f32.mrb[4].mxu1 }
 0x422   : > { %v1393_v47 = vpop.f32.mrb[5].mxu1  ;;  %v831_v4 = vadd.f32 128.0, %v830_v46 }
 0x423   : > { %v833_v48 = vpop.f32.mrb[6].mxu1 }
 0x424   : > { %v1394_v49 = vpop.f32.mrb[7].mxu1  ;;  %v834_v9 = vadd.f32 128.0, %v833_v48 }
 0x429   : > { %v948_v51 = vpop.f32.mrb[8].mxu1 }
 0x42a   : > { %v955_v52 = vmul.f32 %v954_v50, %v948_v51  ;;  %v1407_v53 = vpop.f32.mrb[9].mxu1 }
 0x42b   : > { %v951_v54 = vpop.f32.mrb[10].mxu1 }
 0x42c   : > { %v1426_v55 = vround.rtne.f32 %v955_v52  ;;  %v1408_v56 = vpop.f32.mrb[11].mxu1 }
 0x42e   : > { %v958_v57 = vmul.f32 %v1426_v55, %v957_v0 }
 0x430   : > { %v963_v58 = vpack.c.bf16 %v958_v57, %v958_v57 }
 0x432   : > { %1412 = vmatmul.mubr.msk.bf16.vlgmr.msra.gmra.mrb[12].mxu0 %vm627_vm1, %v963_v58 }
 0x505   : > { %v1007_v59 = vpop.f32.mrb[12].mxu0 }
 0x506   : > { %v1013_v60 = vpack.c.bf16 %v1007_v59, %v1007_v59  ;;  %v1413_v61 = vpop.f32.mrb[13].mxu0 }
 0x507   : > { %v1010_v62 = vpop.f32.mrb[14].mxu0 }
 0x508   : > { %v1025_v63 = vsel %vm1023_vm3, %v1013_v60, 0  ;;  %v1414_v1 = vpop.f32.mrb[15].mxu0 }
 0x509   : > { %1416 = vmatpush3.bf16.msra.mxu1 %v1025_v63 }
 0x50c   : > { %1418 = vmatmul.mubr.msk.bf16.vlgmr.msra.gmra.mrb[12].mxu1 %vm1019_vm4, %v1559_v2 }
 0x5df   : > { %v1061_v3 = vpop.f32.mrb[12].mxu1 }
 0x5e0   : > { %v1129_v5 = vmul.f32 1.772, %v1061_v3  ;;  %v1419_v6 = vpop.f32.mrb[13].mxu1  ;;  %v1068_v7 = vmul.f32 1.402, %v1061_v3 }
 0x5e1   : > { %v1064_v8 = vpop.f32.mrb[14].mxu1  ;;  %v1100_v19 = vmul.f32 0.714136, %v1061_v3  ;;  %v1096_v32 = vmul.f32 0.344136, %v1061_v3 }
 0x5e2   : > { %v1131_v10 = vadd.f32 %v1129_v5, %v831_v4  ;;  %v1130_v11 = vmul.f32 1.772, %v1064_v8  ;;  %1072 = vrot.lane.b32.xlu0 %v1068_v7, %s1806_s20  ;;  %v1069_v12 = vmul.f32 1.402, %v1064_v8  ;;  %v1420_v13 = vpop.f32.mrb[15].mxu1 }
 0x5e3   : > { %v1101_v16 = vmul.f32 0.714136, %v1064_v8  ;;  %v1097_v29 = vmul.f32 0.344136, %v1064_v8  ;;  %v1098_v41 = vsub.f32 %v831_v4, %v1096_v32 }
 0x5e4   : > { %v1133_v14 = vmax.f32 %v1131_v10, 0.0  ;;  %v1132_v15 = vadd.f32 %v1130_v11, %v834_v9  ;;  %1074 = vrot.lane.b32.xlu1 %v1069_v12, %s1806_s20 }
 0x5e5   : > { %v1099_v36 = vsub.f32 %v834_v9, %v1097_v29 }
 0x5e6   : > { %v1135_v17 = vmin.f32 %v1133_v14, 255.0  ;;  %v1134_v18 = vmax.f32 %v1132_v15, 0.0  ;;  %1106 = vrot.lane.b32.xlu0 %v1101_v16, %s1806_s20 }
 0x5e8   : > { %v1431_v20 = vround.rtne.f32 %v1135_v17  ;;  %v1136_v21 = vmin.f32 %v1134_v18, 255.0  ;;  %1104 = vrot.lane.b32.xlu1 %v1100_v19, %s1806_s20 }
 0x5ea   : > { %v1139_v22 = vmul.f32 0.007843138, %v1431_v20  ;;  %v1432_v23 = vround.rtne.f32 %v1136_v21 }
 0x5ec   : > { %v1345_v24 = vadd.f32 -1.0, %v1139_v22  ;;  %v1140_v25 = vmul.f32 0.007843138, %v1432_v23 }
 0x5ee   : > { %v1347_v26 = vclamps-f32 %v1345_v24, 1.0  ;;  %v1346_v27 = vadd.f32 -1.0, %v1140_v25 }
 0x5f0   : > { %1349 = vst.msk [vmem:[%s2200_s16 + $0x20] sm:$0xff] %vm627_vm1, %v1347_v26  ;;  %v1348_v28 = vclamps-f32 %v1346_v27, 1.0 }
 0x5f2   : > { %1350 = vst.msk [vmem:[%s2200_s16 + $0x28] sm:$0xff] %vm627_vm1, %v1348_v28 }
 0x654   : > { %v1073_v30 = vpop.permute.xlu0 %1072 }
 0x655   : > { %v1078_v31 = vadd.f32 %v1073_v30, %v831_v4 }
 0x656   : > { %v1075_v33 = vpop.permute.xlu1 %1074 }
 0x657   : > { %v1080_v34 = vmax.f32 %v1078_v31, 0.0  ;;  %v1079_v35 = vadd.f32 %v1075_v33, %v834_v9 }
 0x658   : > { %v1107_v37 = vpop.permute.xlu0 %1106 }
 0x659   : > { %v1082_v38 = vmin.f32 %v1080_v34, 255.0  ;;  %v1081_v39 = vmax.f32 %v1079_v35, 0.0  ;;  %v1111_v40 = vsub.f32 %v1099_v36, %v1107_v37 }
 0x65a   : > { %v1105_v42 = vpop.permute.xlu1 %1104 }
 0x65b   : > { %v1427_v43 = vround.rtne.f32 %v1082_v38  ;;  %v1083_v44 = vmin.f32 %v1081_v39, 255.0  ;;  %v1113_v45 = vmax.f32 %v1111_v40, 0.0  ;;  %v1110_v46 = vsub.f32 %v1098_v41, %v1105_v42 }
 0x65d   : > { %v1086_v47 = vmul.f32 0.007843138, %v1427_v43  ;;  %v1428_v48 = vround.rtne.f32 %v1083_v44  ;;  %v1115_v49 = vmin.f32 %v1113_v45, 255.0  ;;  %v1112_v50 = vmax.f32 %v1110_v46, 0.0 }
 0x65f   : > { %v1335_v51 = vadd.f32 -1.0, %v1086_v47  ;;  %v1087_v52 = vmul.f32 0.007843138, %v1428_v48  ;;  %v1430_v53 = vround.rtne.f32 %v1115_v49  ;;  %v1114_v0 = vmin.f32 %v1112_v50, 255.0 }
 0x661   : > { %v1337_v54 = vclamps-f32 %v1335_v51, 1.0  ;;  %v1336_v55 = vadd.f32 -1.0, %v1087_v52  ;;  %v1119_v56 = vmul.f32 0.007843138, %v1430_v53  ;;  %v1429_v57 = vround.rtne.f32 %v1114_v0 }
 0x663   : > { %1094 = vst.msk [vmem:[%s2200_s16] sm:$0xff] %vm627_vm1, %v1337_v54  ;;  %v1338_v58 = vclamps-f32 %v1336_v55, 1.0  ;;  %v1340_v59 = vadd.f32 -1.0, %v1119_v56  ;;  %v1118_v60 = vmul.f32 0.007843138, %v1429_v57 }
 0x665   : > { %1095 = vst.msk [vmem:[%s2200_s16 + $0x8] sm:$0xff] %vm627_vm1, %v1338_v58  ;;  %v1342_v61 = vclamps-f32 %v1340_v59, 1.0  ;;  %v1339_v62 = vadd.f32 -1.0, %v1118_v60 }
 0x667   : > { %1344 = vst.msk [vmem:[%s2200_s16 + $0x18] sm:$0xff] %vm627_vm1, %v1342_v61  ;;  %v1341_v63 = vclamps-f32 %v1339_v62, 1.0 }
 0x669   : > { %1343 = vst.msk [vmem:[%s2200_s16 + $0x10] sm:$0xff] %vm627_vm1, %v1341_v63 }
 0x66a   : > { %1715 = shalt.err (!%p1712_p0)
}
 0x66b   : > { %s1716_s20 = scalar_lea.hbm %s2215_s24, 768  ;;  %s1720_s12 = scalar_lea.hbm %s2323_s8, 1536 }
 0x66c   : > { %p1717_p4 = scmp.ne.s32.totalorder %s2215_s24, %s1716_s20  ;;  %p1721_p12 = scmp.lt.u32.totalorder %s2215_s24, %s2323_s8 }
 0x66d   : > { %p1722_p1 = scmp.lt.u32.totalorder %s1720_s12, %s1716_s20  ;;  %p1724_p8 = scmp.lt.u32.totalorder %s1716_s20, %s2215_s24 }
 0x66e   : > { %p1718_p13 = pnand %p1717_p4, %p2061_p5 }
 0x66f   : > { %p1723_p11 = por %p1722_p1, %p1721_p12 }
 0x670   : > { %p1719_p2 = pneg %p1718_p13 }
 0x671   : > { %p1725_p6 = por %p1724_p8, %p1723_p11 }
 0x673   : > { %p1726_p10 = pnand %p1725_p6, %p1719_p2 }
 0x675   : > { %1729 = shalt.err (!%p1726_p10)
}
 0x676   : > { %s1808_s25 = smov 128   ;;  %s1809_s13 = smov 8  }
 0x677   : > { %1452 = dma.vmem_to_hbm [thread:$0]  (%p2061_p5), %s2217_s15, 768, %s2215_s24, %s1151_s7, %s1808_s25, %s1808_s25, %s1809_s13  }
 0x678 PF: > { %s2324_s9 = sld [smem:[#allocation16_spill]]  ;;  %s2325_s18 = sld [smem:[#allocation18_spill]] }
 0x679   : > { %p2327_p7 = scmp.ge.s32.totalorder %s1792_s30, 2 }
 0x67e   : > { %s1182_s16 = sand.u32 1, %s2324_s9   ;;  %p2326_p3 = scmp.ne.s32.totalorder %s2325_s18, 0 }
 0x67f   : > { %s1183_s20 = scalar_lea.sflag [#allocation4], %s1182_s16 }
 0x680   : > { %p1472_p9 = pnand %p2327_p7, %p2326_p3 }
 0x682   : > { %1767 = dma.done.wait (!%p1472_p9), %s1183_s20, 768  }
 0x683   : > { %1769 = vsyncadd (!%p1472_p9), %s1183_s20, 4294966528  ;;  %s31_s30 = sadd.s32 1, %s1792_s30   ;;  %s2328_s25 = smov %s1776_s26 }
 0x684   : > { %p28_p0 = scmp.ge.s32.totalorder %s31_s30, 4   ;;  %s2329_s26 = smov %s1780_s27 }
 0x685   : > { %s2330_s27 = smov %s2073_s28  ;;  %s2331_s28 = smov %s1788_s29 }
 0x686   : > { %s2332_s29 = smov %s2334_s11  ;;  %30 = sbr.rel (!%p28_p0) target bundleno = 16 (0x10), region = 135 }
 0x68d   :  { %1188 = vsyncpa [#allocation3], 1 }
 0x68e   :  { %1190 = vsyncpa [#allocation3 + $0x1], 1 }
 0x68f   :  { %1191 = vsyncpa [#allocation6], 1 }
 0x690   :  { %1192 = vsyncpa [#allocation9], 1 }
 0x691   :  { %1193 = vsyncpa [#allocation4], 1 }
 0x692   :  { %1195 = vsyncpa [#allocation4 + $0x1], 1 }

</bundles_post_ra>
